<compile_context>
chip_gen: v6e
topology: v6e:2x2x1
jax: 0.10.0
libtpu: 0.0.40
codegen_flags: <defaults>
</compile_context>

<pallas_src>
import jax
import jax.numpy as jnp
from jax import lax
from jax.experimental import pallas as pl
from jax.experimental.pallas import tpu as pltpu

L_ALPHA = 0.2
USE_RELU = True

NP, NA, NS = 2, 1, 1                       # node counts implied by the module's reshapes
N_NODES = NP + NA + NS                     # 4
IN_DIM = {'P': 16, 'A': 16, 'state': 16}
OUT_DIM = {'P': 32, 'A': 32, 'state': 32}
D = OUT_DIM['P']
DIN = IN_DIM['P']
assert OUT_DIM['A'] == D and OUT_DIM['state'] == D
assert IN_DIM['A'] == DIN and IN_DIM['state'] == DIN

# Packed input-column layout (lane axis of X, row axis of W_aug):
#   [0:16) P features   [16:32) A features   [32:48) state features
#   col 48 = P bias one, col 49 = A bias one, col 50 = state bias one
K_IN = 3 * DIN + 3                          # 51
ONE_P, ONE_A, ONE_S = 3 * DIN, 3 * DIN + 1, 3 * DIN + 2

# Packed output-column layout (lane axis of W_aug / y):
#   [0:D) self (Wh_P/Wh_A/Wh_in)  [D:2D) ->P  [2D:3D) ->A  [3D:4D) ->state
#   [4D:4D+8) attention-logit columns (src p2p/p2a/p2s, dst p2p/p2a/p2s, 2 unused)
N_ATT = 8
N_OUT = 4 * D + N_ATT                       # 136

FC_DIMS = {
    'P':   (IN_DIM['P'], OUT_DIM['P']),
    'A':   (IN_DIM['A'], OUT_DIM['A']),
    'p2p': (IN_DIM['P'], OUT_DIM['P']),
    'p2a': (IN_DIM['P'], OUT_DIM['A']),
    'a2p': (IN_DIM['A'], OUT_DIM['P']),
    'a2a': (IN_DIM['A'], OUT_DIM['A']),
    'p2s': (IN_DIM['P'], OUT_DIM['state']),
    'a2s': (IN_DIM['A'], OUT_DIM['state']),
    'in':  (IN_DIM['state'], OUT_DIM['state']),
}
ATTN_DIMS = {'p2p': OUT_DIM['P'], 'p2a': OUT_DIM['A'], 'a2p': OUT_DIM['P'],
             'a2a': OUT_DIM['A'], 'p2s': OUT_DIM['state'], 'a2s': OUT_DIM['state']}


# ------------------------------- the kernel ---------------------------------
def hetgat_kernel(hp_ref, ha_ref, hs_ref, w_ref, out_ref, x_ref):
    # ---- build the block-structured [features | bias-ones] matrix in VMEM ----
    row = lax.broadcasted_iota(jnp.int32, (N_NODES, K_IN), 0)
    col = lax.broadcasted_iota(jnp.int32, (N_NODES, K_IN), 1)
    ones_pos = (((row <= 1) & (col == ONE_P)) |
                ((row == 2) & (col == ONE_A)) |
                ((row == 3) & (col == ONE_S)))
    x_ref[...] = jnp.where(ones_pos, 1.0, 0.0)
    x_ref[0:2, 0:DIN] = hp_ref[...]                 # P features -> rows 0,1
    x_ref[2:3, DIN:2 * DIN] = ha_ref[...]           # A features -> row 2
    x_ref[3:4, 2 * DIN:3 * DIN] = hs_ref[...]       # state features -> row 3

    # ---- single MXU pass: all 9 linears (+bias) AND all attention logit halves
    y = jnp.dot(x_ref[...], w_ref[...], preferred_element_type=jnp.float32)  # (4, 136)

    def lrelu(v):
        return jnp.where(v > 0, v, L_ALPHA * v)

    # Logit pieces produced by the folded attention columns (see pack_params):
    #   s[0:2,0]=es_p2p  s[0:2,1]=es_p2a  s[0:2,2]=es_p2s
    #   s[0,3],s[1,3]=ed_p2p(P0,P1)       s[2,4]=ed_p2a     s[3,5]=ed_p2s
    s = y[:, 4 * D:]                                                          # (4, 8)

    # (2 src, 4 dst) logit tile; dst order == output rows [P0, P1, A, state]
    es = jnp.concatenate([s[0:2, 0:1], s[0:2, 0:3]], axis=1)                  # (2, 4)
    ed = jnp.concatenate([s[0:1, 3:4], s[1:2, 3:4],
                          s[2:3, 4:5], s[3:4, 5:6]], axis=1)                  # (1, 4)
    e = lrelu(es + ed)                                                        # (2, 4)
    # 2-way softmax over the P sources == sigmoid of the logit difference.
    alpha0 = 1.0 / (1.0 + jnp.exp(e[1:2, :] - e[0:1, :]))                     # (1, 4)

    z0 = y[0:1, D:4 * D]          # P0-sourced messages  [p2p | p2a | p2s]
    z1 = y[1:2, D:4 * D]          # P1-sourced messages
    dz = z0 - z1
    za = y[2:3, D:4 * D]          # A-sourced messages   [a2p | a2a | a2s]
    # a2p / a2a / a2s / in mailboxes hold a single message -> softmax == 1,
    # the message (and Wh_in via the 'in' self loop) passes straight through.

    def act(v):
        return jnp.maximum(v, 0.0) if USE_RELU else v

    # h = Wh_self + attended P-message + pass-through A-message (direct row stores)
    m = z1[:, 0:D] + alpha0[:, 0:1] * dz[:, 0:D]                 # p2p -> P0
    out_ref[0:1, :] = act(y[0:1, 0:D] + m + za[:, 0:D])
    m = z1[:, 0:D] + alpha0[:, 1:2] * dz[:, 0:D]                 # p2p -> P1
    out_ref[1:2, :] = act(y[1:2, 0:D] + m + za[:, 0:D])
    m = z1[:, D:2 * D] + alpha0[:, 2:3] * dz[:, D:2 * D]         # p2a -> A
    out_ref[2:3, :] = act(y[2:3, 0:D] + m + za[:, D:2 * D])
    m = z1[:, 2 * D:] + alpha0[:, 3:4] * dz[:, 2 * D:]           # p2s -> state
    out_ref[3:4, :] = act(y[3:4, 0:D] + m + za[:, 2 * D:])


# ----------------------- one-time parameter packing --------------------------
def pack_params(params):
    """Pack all 9 linears + the attention vectors into W_aug (51, 136).

    Run ONCE per parameter set (outside the per-call jit) and reuse the result.
    The attention matmul is folded in:  (X @ W) @ A == X @ (W @ A); the bias
    rows carry through correctly.
    """
    fc, attn = params['fc'], params['attn']
    for n, (din, dout) in FC_DIMS.items():
        assert fc[n][0].shape == (din, dout) and fc[n][1].shape == (dout,)
    for n, d in ATTN_DIMS.items():
        assert attn[n][0].shape == (d, 1) and attn[n][1].shape == (d, 1)

    def wcols(names):
        return jnp.concatenate([fc[n][0] for n in names], axis=1)            # (16, k*D)

    def brow(names):
        return jnp.concatenate([fc[n][1] for n in names])[None, :]           # (1, k*D)

    pad3 = ((0, 0), (0, 3 * D))
    w_all = jnp.concatenate([
        wcols(['P', 'p2p', 'p2a', 'p2s']),          # rows  0:16  (P features)
        wcols(['A', 'a2p', 'a2a', 'a2s']),          # rows 16:32  (A features)
        jnp.pad(wcols(['in']), pad3),               # rows 32:48  (state features)
        brow(['P', 'p2p', 'p2a', 'p2s']),           # row 48      (P bias)
        brow(['A', 'a2p', 'a2a', 'a2s']),           # row 49      (A bias)
        jnp.pad(brow(['in']), pad3),                # row 50      (state bias)
    ], axis=0)                                                               # (51, 128)

    # Only p2p/p2a/p2s attention vectors influence the output on this graph:
    # a2*/in mailboxes hold a single message so their softmax is identically 1.
    a_attn = jnp.zeros((4 * D, N_ATT), jnp.float32)
    a_attn = a_attn.at[1 * D:2 * D, 0].set(attn['p2p'][0][:, 0])   # src half p2p (Wh_p2p)
    a_attn = a_attn.at[2 * D:3 * D, 1].set(attn['p2a'][0][:, 0])   # src half p2a (Wh_p2a)
    a_attn = a_attn.at[3 * D:4 * D, 2].set(attn['p2s'][0][:, 0])   # src half p2s (Wh_p2s)
    a_attn = a_attn.at[0:D, 3].set(attn['p2p'][1][:, 0])           # dst half p2p (Wh_P)
    a_attn = a_attn.at[0:D, 4].set(attn['p2a'][1][:, 0])           # dst half p2a (Wh_A)
    a_attn = a_attn.at[0:D, 5].set(attn['p2s'][1][:, 0])           # dst half p2s (Wh_in)

    return jnp.concatenate([w_all, w_all @ a_attn], axis=1)                  # (51, 136)


# ------------------------------ per-call forward -----------------------------
@jax.jit
def hetgat_forward(hP, hA, hS, w_aug):
    vmem = pl.BlockSpec(memory_space=pltpu.MemorySpace.VMEM)
    out = pl.pallas_call(
        hetgat_kernel,
        out_shape=jax.ShapeDtypeStruct((N_NODES, D), jnp.float32),
        in_specs=[vmem, vmem, vmem, vmem],
        out_specs=vmem,
        scratch_shapes=[pltpu.VMEM((N_NODES, K_IN), jnp.float32)],
    )(hP, hA, hS, w_aug)
    return out[0:NP], out[NP:NP + NA], out[NP + NA:]


# ----------------------- deterministic parameter init -----------------------
def _xavier_normal(key, shape, gain):
    fan_in, fan_out = shape
    std = gain * (2.0 / (fan_in + fan_out)) ** 0.5
    return std * jax.random.normal(key, shape, dtype=jnp.float32)


def init_params(key):
    gain = 2.0 ** 0.5  # calculate_gain('relu')
    fc_names, attn_names = list(FC_DIMS), list(ATTN_DIMS)
    keys = jax.random.split(key, len(fc_names) + len(attn_names))
    fc = {}
    for k, n in zip(keys[:len(fc_names)], fc_names):
        din, dout = FC_DIMS[n]
        fc[n] = (_xavier_normal(k, (din, dout), gain),     # stored as (in, out) == torch W.T
                 jnp.zeros((dout,), jnp.float32))
    attn = {}
    for k, n in zip(keys[len(fc_names):], attn_names):
        d = ATTN_DIMS[n]
        a = _xavier_normal(k, (2 * d, 1), gain)            # torch (1, 2D) transposed
        attn[n] = (a[:d, :], a[d:, :])                     # (src half, dst half)
    return {'fc': fc, 'attn': attn}


# --------------------------- pure-JAX reference ------------------------------
def reference(feat_dict, params):
    fc, attn = params['fc'], params['attn']

    def lin(x, name):
        w, b = fc[name]
        return x @ w + b

    def lrelu(x):
        return jnp.where(x > 0, x, L_ALPHA * x)

    def gat(src_z, dst_wh, name):
        a_s, a_d = attn[name]
        e = lrelu(src_z @ a_s + (dst_wh @ a_d).T)           # (Ns, Nd)
        e = e - e.max(axis=0, keepdims=True)
        p = jnp.exp(e)
        alpha = p / p.sum(axis=0, keepdims=True)            # softmax over sources
        return alpha.T @ src_z

    hP, hA, hS = feat_dict['P'], feat_dict['A'], feat_dict['state']
    WhP, WhA, Whin = lin(hP, 'P'), lin(hA, 'A'), lin(hS, 'in')
    h_P = WhP + gat(lin(hP, 'p2p'), WhP, 'p2p') + gat(lin(hA, 'a2p'), WhP, 'a2p')
    h_A = WhA + gat(lin(hP, 'p2a'), WhA, 'p2a') + gat(lin(hA, 'a2a'), WhA, 'a2a')
    h_S = Whin + gat(lin(hP, 'p2s'), Whin, 'p2s') + gat(lin(hA, 'a2s'), Whin, 'a2s')
    if USE_RELU:
        h_P, h_A, h_S = jnp.maximum(h_P, 0.), jnp.maximum(h_A, 0.), jnp.maximum(h_S, 0.)
    return h_P, h_A, h_S


if __name__ == "__main__":
    key = jax.random.PRNGKey(0)
    kf, kp = jax.random.split(key)
    kP, kA, kS = jax.random.split(kf, 3)
    hP = jax.random.normal(kP, (NP, IN_DIM['P']), jnp.float32)
    hA = jax.random.normal(kA, (NA, IN_DIM['A']), jnp.float32)
    hS = jax.random.normal(kS, (NS, IN_DIM['state']), jnp.float32)
    assert hP.shape == (NP, DIN) and hA.shape == (NA, DIN) and hS.shape == (NS, DIN)

    params = init_params(kp)
    w_aug = jax.block_until_ready(pack_params(params))   # packed ONCE, reused every call
    assert w_aug.shape == (K_IN, N_OUT)

    out = jax.block_until_ready(hetgat_forward(hP, hA, hS, w_aug))
    ref = reference({'P': hP, 'A': hA, 'state': hS}, params)

    # Exact division (no approx reciprocal) keeps the kernel within ~1e-4 of the
    # f32 reference; 2e-3 leaves margin for MXU f32 rounding.
    for o, r in zip(out, ref):
        assert o.shape == r.shape and o.dtype == jnp.float32
        assert jnp.allclose(o, r, atol=2e-3, rtol=2e-3), "mismatch vs reference"

    print("KERNEL_OK")
</pallas_src>

<mosaic_0001>
module attributes {stable_mosaic.version = 11 : i64} {
  func.func @hetgat_kernel(%arg0: memref<2x16xf32, #tpu.memory_space<vmem>>, %arg1: memref<1x16xf32, #tpu.memory_space<vmem>>, %arg2: memref<1x16xf32, #tpu.memory_space<vmem>>, %arg3: memref<51x136xf32, #tpu.memory_space<vmem>>, %arg4: memref<4x32xf32, #tpu.memory_space<vmem>>, %arg5: memref<4x51xf32, #tpu.memory_space<vmem>>) attributes {dimension_semantics = [], scalar_prefetch = 0 : i64, scratch_operands = 1 : i64, tpu.core_type = #tpu.core_type<tc>} {
    %0 = tpu.iota {dimensions = array<i32: 0>} : vector<4x51xi32>
    %1 = tpu.iota {dimensions = array<i32: 1>} : vector<4x51xi32>
    %c1_i32 = arith.constant 1 : i32
    %2 = vector.broadcast %c1_i32 : i32 to vector<4x51xi32>
    %3 = arith.cmpi sle, %0, %2 : vector<4x51xi32>
    %c48_i32 = arith.constant 48 : i32
    %4 = vector.broadcast %c48_i32 : i32 to vector<4x51xi32>
    %5 = arith.cmpi eq, %1, %4 : vector<4x51xi32>
    %6 = arith.andi %3, %5 : vector<4x51xi1>
    %c2_i32 = arith.constant 2 : i32
    %7 = vector.broadcast %c2_i32 : i32 to vector<4x51xi32>
    %8 = arith.cmpi eq, %0, %7 : vector<4x51xi32>
    %c49_i32 = arith.constant 49 : i32
    %9 = vector.broadcast %c49_i32 : i32 to vector<4x51xi32>
    %10 = arith.cmpi eq, %1, %9 : vector<4x51xi32>
    %11 = arith.andi %8, %10 : vector<4x51xi1>
    %12 = arith.ori %6, %11 : vector<4x51xi1>
    %c3_i32 = arith.constant 3 : i32
    %13 = vector.broadcast %c3_i32 : i32 to vector<4x51xi32>
    %14 = arith.cmpi eq, %0, %13 : vector<4x51xi32>
    %c50_i32 = arith.constant 50 : i32
    %15 = vector.broadcast %c50_i32 : i32 to vector<4x51xi32>
    %16 = arith.cmpi eq, %1, %15 : vector<4x51xi32>
    %17 = arith.andi %14, %16 : vector<4x51xi1>
    %18 = arith.ori %12, %17 : vector<4x51xi1>
    %cst = arith.constant 1.000000e+00 : f32
    %cst_0 = arith.constant 0.000000e+00 : f32
    %19 = vector.broadcast %cst : f32 to vector<4x51xf32>
    %20 = vector.broadcast %cst_0 : f32 to vector<4x51xf32>
    %21 = arith.select %18, %19, %20 : vector<4x51xi1>, vector<4x51xf32>
    %c0 = arith.constant 0 : index
    %c0_1 = arith.constant 0 : index
    %22 = vector.load %arg5[%c0, %c0_1] : memref<4x51xf32, #tpu.memory_space<vmem>>, vector<4x51xf32>
    tpu.vector_store %arg5[%c0, %c0_1], %21 {strides = array<i32>} : memref<4x51xf32, #tpu.memory_space<vmem>>, vector<4x51xf32>,
    %c0_2 = arith.constant 0 : index
    %c0_3 = arith.constant 0 : index
    %23 = vector.load %arg0[%c0_2, %c0_3] : memref<2x16xf32, #tpu.memory_space<vmem>>, vector<2x16xf32>
    %c0_4 = arith.constant 0 : index
    %c0_5 = arith.constant 0 : index
    %24 = vector.load %arg5[%c0_4, %c0_5] : memref<4x51xf32, #tpu.memory_space<vmem>>, vector<2x16xf32>
    tpu.vector_store %arg5[%c0_4, %c0_5], %23 {strides = array<i32>} : memref<4x51xf32, #tpu.memory_space<vmem>>, vector<2x16xf32>,
    %c0_6 = arith.constant 0 : index
    %c0_7 = arith.constant 0 : index
    %25 = vector.load %arg1[%c0_6, %c0_7] : memref<1x16xf32, #tpu.memory_space<vmem>>, vector<1x16xf32>
    %c2 = arith.constant 2 : index
    %c16 = arith.constant 16 : index
    %26 = vector.load %arg5[%c2, %c16] : memref<4x51xf32, #tpu.memory_space<vmem>>, vector<1x16xf32>
    tpu.vector_store %arg5[%c2, %c16], %25 {strides = array<i32>} : memref<4x51xf32, #tpu.memory_space<vmem>>, vector<1x16xf32>,
    %c0_8 = arith.constant 0 : index
    %c0_9 = arith.constant 0 : index
    %27 = vector.load %arg2[%c0_8, %c0_9] : memref<1x16xf32, #tpu.memory_space<vmem>>, vector<1x16xf32>
    %c3 = arith.constant 3 : index
    %c32 = arith.constant 32 : index
    %28 = vector.load %arg5[%c3, %c32] : memref<4x51xf32, #tpu.memory_space<vmem>>, vector<1x16xf32>
    tpu.vector_store %arg5[%c3, %c32], %27 {strides = array<i32>} : memref<4x51xf32, #tpu.memory_space<vmem>>, vector<1x16xf32>,
    %c0_10 = arith.constant 0 : index
    %c0_11 = arith.constant 0 : index
    %29 = vector.load %arg5[%c0_10, %c0_11] : memref<4x51xf32, #tpu.memory_space<vmem>>, vector<4x51xf32>
    %c0_12 = arith.constant 0 : index
    %c0_13 = arith.constant 0 : index
    %30 = vector.load %arg3[%c0_12, %c0_13] : memref<51x136xf32, #tpu.memory_space<vmem>>, vector<51x136xf32>
    %cst_14 = arith.constant dense<0.000000e+00> : vector<4x136xf32>
    %31 = tpu.matmul %29, %30, %cst_14 {dimension_numbers = #tpu.dot_dimension_numbers<[1], [0], [0], [1], [0, 0, 1, 1], [], []>} : vector<4x51xf32>, vector<51x136xf32>, vector<4x136xf32> -> vector<4x136xf32>
    %32 = vector.extract_strided_slice %31 {offsets = [0, 128], sizes = [4, 8], strides = [1, 1]} : vector<4x136xf32> to vector<4x8xf32>
    %33 = vector.extract_strided_slice %32 {offsets = [0, 0], sizes = [2, 1], strides = [1, 1]} : vector<4x8xf32> to vector<2x1xf32>
    %34 = vector.extract_strided_slice %32 {offsets = [0, 0], sizes = [2, 3], strides = [1, 1]} : vector<4x8xf32> to vector<2x3xf32>
    %35 = tpu.concatenate %33, %34 in 1 : vector<2x1xf32>, vector<2x3xf32> -> vector<2x4xf32>
    %36 = vector.extract_strided_slice %32 {offsets = [0, 3], sizes = [1, 1], strides = [1, 1]} : vector<4x8xf32> to vector<1x1xf32>
    %37 = vector.extract_strided_slice %32 {offsets = [1, 3], sizes = [1, 1], strides = [1, 1]} : vector<4x8xf32> to vector<1x1xf32>
    %38 = vector.extract_strided_slice %32 {offsets = [2, 4], sizes = [1, 1], strides = [1, 1]} : vector<4x8xf32> to vector<1x1xf32>
    %39 = vector.extract_strided_slice %32 {offsets = [3, 5], sizes = [1, 1], strides = [1, 1]} : vector<4x8xf32> to vector<1x1xf32>
    %40 = tpu.concatenate %36, %37, %38, %39 in 1 : vector<1x1xf32>, vector<1x1xf32>, vector<1x1xf32>, vector<1x1xf32> -> vector<1x4xf32>
    %41 = vector.broadcast %40 : vector<1x4xf32> to vector<2x4xf32>
    %42 = arith.addf %35, %41 : vector<2x4xf32>
    %cst_15 = arith.constant 0.000000e+00 : f32
    %43 = vector.broadcast %cst_15 : f32 to vector<2x4xf32>
    %44 = arith.cmpf ogt, %42, %43 : vector<2x4xf32>
    %cst_16 = arith.constant 2.000000e-01 : f32
    %45 = vector.broadcast %cst_16 : f32 to vector<2x4xf32>
    %46 = arith.mulf %45, %42 : vector<2x4xf32>
    %47 = arith.select %44, %42, %46 : vector<2x4xi1>, vector<2x4xf32>
    %48 = vector.extract_strided_slice %47 {offsets = [1, 0], sizes = [1, 4], strides = [1, 1]} : vector<2x4xf32> to vector<1x4xf32>
    %49 = vector.extract_strided_slice %47 {offsets = [0, 0], sizes = [1, 4], strides = [1, 1]} : vector<2x4xf32> to vector<1x4xf32>
    %50 = arith.subf %48, %49 : vector<1x4xf32>
    %51 = math.exp %50 : vector<1x4xf32>
    %cst_17 = arith.constant 1.000000e+00 : f32
    %52 = vector.broadcast %cst_17 : f32 to vector<1x4xf32>
    %53 = arith.addf %52, %51 : vector<1x4xf32>
    %cst_18 = arith.constant 1.000000e+00 : f32
    %54 = vector.broadcast %cst_18 : f32 to vector<1x4xf32>
    %55 = arith.divf %54, %53 : vector<1x4xf32>
    %56 = vector.extract_strided_slice %31 {offsets = [0, 32], sizes = [1, 96], strides = [1, 1]} : vector<4x136xf32> to vector<1x96xf32>
    %57 = vector.extract_strided_slice %31 {offsets = [1, 32], sizes = [1, 96], strides = [1, 1]} : vector<4x136xf32> to vector<1x96xf32>
    %58 = arith.subf %56, %57 : vector<1x96xf32>
    %59 = vector.extract_strided_slice %31 {offsets = [2, 32], sizes = [1, 96], strides = [1, 1]} : vector<4x136xf32> to vector<1x96xf32>
    %60 = vector.extract_strided_slice %57 {offsets = [0, 0], sizes = [1, 32], strides = [1, 1]} : vector<1x96xf32> to vector<1x32xf32>
    %61 = vector.extract_strided_slice %55 {offsets = [0, 0], sizes = [1, 1], strides = [1, 1]} : vector<1x4xf32> to vector<1x1xf32>
    %62 = vector.extract_strided_slice %58 {offsets = [0, 0], sizes = [1, 32], strides = [1, 1]} : vector<1x96xf32> to vector<1x32xf32>
    %63 = vector.broadcast %61 : vector<1x1xf32> to vector<1x32xf32>
    %64 = arith.mulf %63, %62 : vector<1x32xf32>
    %65 = arith.addf %60, %64 : vector<1x32xf32>
    %66 = vector.extract_strided_slice %31 {offsets = [0, 0], sizes = [1, 32], strides = [1, 1]} : vector<4x136xf32> to vector<1x32xf32>
    %67 = arith.addf %66, %65 : vector<1x32xf32>
    %68 = vector.extract_strided_slice %59 {offsets = [0, 0], sizes = [1, 32], strides = [1, 1]} : vector<1x96xf32> to vector<1x32xf32>
    %69 = arith.addf %67, %68 : vector<1x32xf32>
    %cst_19 = arith.constant 0.000000e+00 : f32
    %70 = vector.broadcast %cst_19 : f32 to vector<1x32xf32>
    %71 = arith.maximumf %69, %70 : vector<1x32xf32>
    %c0_20 = arith.constant 0 : index
    %c0_21 = arith.constant 0 : index
    %72 = vector.load %arg4[%c0_20, %c0_21] : memref<4x32xf32, #tpu.memory_space<vmem>>, vector<1x32xf32>
    tpu.vector_store %arg4[%c0_20, %c0_21], %71 {strides = array<i32>} : memref<4x32xf32, #tpu.memory_space<vmem>>, vector<1x32xf32>,
    %73 = vector.extract_strided_slice %57 {offsets = [0, 0], sizes = [1, 32], strides = [1, 1]} : vector<1x96xf32> to vector<1x32xf32>
    %74 = vector.extract_strided_slice %55 {offsets = [0, 1], sizes = [1, 1], strides = [1, 1]} : vector<1x4xf32> to vector<1x1xf32>
    %75 = vector.extract_strided_slice %58 {offsets = [0, 0], sizes = [1, 32], strides = [1, 1]} : vector<1x96xf32> to vector<1x32xf32>
    %76 = vector.broadcast %74 : vector<1x1xf32> to vector<1x32xf32>
    %77 = arith.mulf %76, %75 : vector<1x32xf32>
    %78 = arith.addf %73, %77 : vector<1x32xf32>
    %79 = vector.extract_strided_slice %31 {offsets = [1, 0], sizes = [1, 32], strides = [1, 1]} : vector<4x136xf32> to vector<1x32xf32>
    %80 = arith.addf %79, %78 : vector<1x32xf32>
    %81 = vector.extract_strided_slice %59 {offsets = [0, 0], sizes = [1, 32], strides = [1, 1]} : vector<1x96xf32> to vector<1x32xf32>
    %82 = arith.addf %80, %81 : vector<1x32xf32>
    %cst_22 = arith.constant 0.000000e+00 : f32
    %83 = vector.broadcast %cst_22 : f32 to vector<1x32xf32>
    %84 = arith.maximumf %82, %83 : vector<1x32xf32>
    %c1 = arith.constant 1 : index
    %c0_23 = arith.constant 0 : index
    %85 = vector.load %arg4[%c1, %c0_23] : memref<4x32xf32, #tpu.memory_space<vmem>>, vector<1x32xf32>
    tpu.vector_store %arg4[%c1, %c0_23], %84 {strides = array<i32>} : memref<4x32xf32, #tpu.memory_space<vmem>>, vector<1x32xf32>,
    %86 = vector.extract_strided_slice %57 {offsets = [0, 32], sizes = [1, 32], strides = [1, 1]} : vector<1x96xf32> to vector<1x32xf32>
    %87 = vector.extract_strided_slice %55 {offsets = [0, 2], sizes = [1, 1], strides = [1, 1]} : vector<1x4xf32> to vector<1x1xf32>
    %88 = vector.extract_strided_slice %58 {offsets = [0, 32], sizes = [1, 32], strides = [1, 1]} : vector<1x96xf32> to vector<1x32xf32>
    %89 = vector.broadcast %87 : vector<1x1xf32> to vector<1x32xf32>
    %90 = arith.mulf %89, %88 : vector<1x32xf32>
    %91 = arith.addf %86, %90 : vector<1x32xf32>
    %92 = vector.extract_strided_slice %31 {offsets = [2, 0], sizes = [1, 32], strides = [1, 1]} : vector<4x136xf32> to vector<1x32xf32>
    %93 = arith.addf %92, %91 : vector<1x32xf32>
    %94 = vector.extract_strided_slice %59 {offsets = [0, 32], sizes = [1, 32], strides = [1, 1]} : vector<1x96xf32> to vector<1x32xf32>
    %95 = arith.addf %93, %94 : vector<1x32xf32>
    %cst_24 = arith.constant 0.000000e+00 : f32
    %96 = vector.broadcast %cst_24 : f32 to vector<1x32xf32>
    %97 = arith.maximumf %95, %96 : vector<1x32xf32>
    %c2_25 = arith.constant 2 : index
    %c0_26 = arith.constant 0 : index
    %98 = vector.load %arg4[%c2_25, %c0_26] : memref<4x32xf32, #tpu.memory_space<vmem>>, vector<1x32xf32>
    tpu.vector_store %arg4[%c2_25, %c0_26], %97 {strides = array<i32>} : memref<4x32xf32, #tpu.memory_space<vmem>>, vector<1x32xf32>,
    %99 = vector.extract_strided_slice %57 {offsets = [0, 64], sizes = [1, 32], strides = [1, 1]} : vector<1x96xf32> to vector<1x32xf32>
    %100 = vector.extract_strided_slice %55 {offsets = [0, 3], sizes = [1, 1], strides = [1, 1]} : vector<1x4xf32> to vector<1x1xf32>
    %101 = vector.extract_strided_slice %58 {offsets = [0, 64], sizes = [1, 32], strides = [1, 1]} : vector<1x96xf32> to vector<1x32xf32>
    %102 = vector.broadcast %100 : vector<1x1xf32> to vector<1x32xf32>
    %103 = arith.mulf %102, %101 : vector<1x32xf32>
    %104 = arith.addf %99, %103 : vector<1x32xf32>
    %105 = vector.extract_strided_slice %31 {offsets = [3, 0], sizes = [1, 32], strides = [1, 1]} : vector<4x136xf32> to vector<1x32xf32>
    %106 = arith.addf %105, %104 : vector<1x32xf32>
    %107 = vector.extract_strided_slice %59 {offsets = [0, 64], sizes = [1, 32], strides = [1, 1]} : vector<1x96xf32> to vector<1x32xf32>
    %108 = arith.addf %106, %107 : vector<1x32xf32>
    %cst_27 = arith.constant 0.000000e+00 : f32
    %109 = vector.broadcast %cst_27 : f32 to vector<1x32xf32>
    %110 = arith.maximumf %108, %109 : vector<1x32xf32>
    %c3_28 = arith.constant 3 : index
    %c0_29 = arith.constant 0 : index
    %111 = vector.load %arg4[%c3_28, %c0_29] : memref<4x32xf32, #tpu.memory_space<vmem>>, vector<1x32xf32>
    tpu.vector_store %arg4[%c3_28, %c0_29], %110 {strides = array<i32>} : memref<4x32xf32, #tpu.memory_space<vmem>>, vector<1x32xf32>,
    return
  }
}

</mosaic_0001>

<bundles_post_ra>
// kernel: hetgat_forward.1
= control target key start
LH: loop header
LB: loop body
LE: loop exit
PB: predicated region body
PF: predicated region fallthrough
CT: control target
= control target key end

     0   :  { %9 = vsyncpa [#allocation4], 0  ;;  %s531_s0 = inlined_call_operand.vmem [shape: f32[2,16], index: 0, kind: input, shape index: {}]   ;;  %s532_s1 = inlined_call_operand.vmem [shape: f32[1,16], index: 1, kind: input, shape index: {}]   ;;  %s533_s2 = inlined_call_operand.hbm [shape: f32[1,16], index: 2, kind: input, shape index: {}]   ;;  %s534_s3 = inlined_call_operand.hbm [shape: f32[51,136], index: 3, kind: input, shape index: {}]   ;;  %s535_s4 = inlined_call_operand.vmem [shape: f32[4,32], index: 4, kind: output, shape index: {}]  }
   0x1   :  { %10 = vsyncpa [#allocation6], 0  ;;  %s414_s15 = smov [#allocation3]   ;;  %s415_s17 = smov [#allocation5]  }
   0x2   :  { %s21_s16 = sshll.u32 %s414_s15, 4  ;;  %s30_s18 = sshll.u32 %s415_s17, 4  ;;  %s22_s16 = int_to_ptr.vmem [resolvable:$true] %s21_s16  ;;  %s31_s18 = int_to_ptr.vmem [resolvable:$true] %s30_s18 }
   0x3   :  { %s378_s19 = scalar_lea.vmem %s22_s16, 16  ;;  %s382_s20 = scalar_lea.vmem %s22_s16, 32 }
   0x4   :  { %p379_p0 = scmp.ne.s32.totalorder %s22_s16, %s378_s19  ;;  %p383_p1 = scmp.lt.s32.totalorder %s22_s16, %s22_s16 }
   0x5   :  { %p384_p2 = scmp.lt.s32.totalorder %s382_s20, %s378_s19 }
   0x7   :  { %p385_p3 = por %p384_p2, %p383_p1 }
   0x9   :  { %p386_p4 = pnand %p385_p3, %p379_p0 }
   0xb   :  { %389 = shalt.err (!%p386_p4)
}
   0xc   :  { %24 = dma.hbm_to_vmem [thread:$0]  %s533_s2, 16, %s22_s16, [#allocation4]  }
   0xd   :  { %s398_s23 = scalar_lea.vmem %s31_s18, 1792  ;;  %p403_p6 = scmp.lt.s32.totalorder %s31_s18, %s31_s18 }
   0xe   :  { %p399_p5 = scmp.ne.s32.totalorder %s31_s18, %s398_s23  ;;  %p404_p7 = scmp.lt.s32.totalorder %s398_s23, %s398_s23 }
  0x10   :  { %p405_p8 = por %p404_p7, %p403_p6 }
  0x12   :  { %p406_p9 = pnand %p405_p8, %p399_p5 }
  0x14   :  { %409 = shalt.err (!%p406_p9)
}
  0x15   :  { %s416_s24 = smov 256   ;;  %s417_s25 = smov 16  }
  0x16   :  { %36 = dma.hbm_to_vmem [thread:$0]  %s534_s3, 1792, %s31_s18, [#allocation6], %s416_s24, %s416_s24, %s417_s25  }
  0x17   :  { %410 = dma.done.wait [#allocation4], 16  }
  0x18   :  { %411 = vsyncadd [#allocation4], 4294967280 }
  0x19   :  { %412 = dma.done.wait [#allocation6], 1792  }
  0x1a   :  { %413 = vsyncadd [#allocation6], 4294965504  ;;  %v43_v0 = vlaneseq  ;;  %v418_v1 = vmov 0.0   ;;  %vm105_vm2 = vcmask 1042432   ;;  %v341_v4 = vld [vmem:[%s532_s1] ss:$0 sm:$0xff] }
  0x1b   :  { %176 = vmatprep.mubr.f32.mxu0 %v418_v1  ;;  %v100_v5 = vld [vmem:[#allocation5 + $0x68] sm:$0x7]  ;;  %70 = vrot.lane.b32.xlu0 %v341_v4, %s417_s25  ;;  %v99_v7 = vld [vmem:[#allocation5 + $0x60] sm:$0x7]  ;;  %v98_v8 = vld [vmem:[#allocation5 + $0x58] sm:$0xff]  ;;  %s419_s1 = smov 32  }
  0x1c   :  { %v460_v2 = vshrl.u32 %v43_v0, 7  ;;  %v46_v3 = vand.u32 127, %v43_v0  ;;  %343 = vmatprep.subr.msk.mxu0 %vm105_vm2, %v100_v5  ;;  %v97_v9 = vld [vmem:[#allocation5 + $0x50] sm:$0xff]  ;;  %v342_v10 = vld [vmem:[#allocation3] ss:$0 sm:$0xff]  ;;  %v96_v11 = vld [vmem:[#allocation5 + $0x48] sm:$0xff] }
  0x1d   :  { %344 = vmatpush1.msk.msra.mxu0 %vm105_vm2, %v99_v7  ;;  %v95_v13 = vld [vmem:[#allocation5 + $0x40] sm:$0xff]  ;;  %v94_v14 = vld [vmem:[#allocation5 + $0x38] sm:$0xff]  ;;  %v93_v15 = vld [vmem:[#allocation5 + $0x30] sm:$0xff]  ;;  %vm59_vm11 = vcmask 412672   ;;  %vm62_vm13 = vcmask 123904   ;;  %vm73_vm14 = vcmask 254080  }
  0x1e   :  { %vm47_vm0 = vcmp.le.s32.totalorder %v460_v2, 1  ;;  %vm48_vm1 = vcmp.eq.s32.totalorder %v46_v3, 48  ;;  %vm50_vm3 = vcmp.eq.s32.totalorder %v460_v2, 2  ;;  %vm51_vm4 = vcmp.eq.s32.totalorder %v46_v3, 49  ;;  %132 = vmatprep.subr.mxu0 %v98_v8  ;;  %v92_v16 = vld [vmem:[#allocation5 + $0x28] sm:$0xff]  ;;  %v91_v17 = vld [vmem:[#allocation5 + $0x20] sm:$0xff] }
  0x1f   :  { %vm467_vm5 = vmand %vm47_vm0, %vm48_vm1  ;;  %vm54_vm7 = vcmp.eq.s32.totalorder %v460_v2, 3  ;;  %vm55_vm8 = vcmp.eq.s32.totalorder %v46_v3, 50  ;;  %133 = vmatpush1.msra.mxu0 %v97_v9  ;;  %81 = vrot.lane.b32.xlu0 %v342_v10, %s419_s1  ;;  %v61_v18 = vld [vmem:[%s531_s0] sm:$0x3]  ;;  %v89_v21 = vld [vmem:[#allocation5 + $0x10] sm:$0xff]  ;;  %vm84_vm15 = vcmask 385280  }
  0x20   :  { %vm471_vm6 = vmand %vm50_vm3, %vm51_vm4  ;;  %134 = vmatprep.subr.mxu0 %v96_v11  ;;  %v90_v19 = vld [vmem:[#allocation5 + $0x18] sm:$0xff]  ;;  %v88_v22 = vld [vmem:[#allocation5 + $0x8] sm:$0xff]  ;;  %vm101_vm0 = vcmask 416768   ;;  %s420_s0 = smov 125   ;;  %s421_s30 = smov 126   ;;  %v424_v35 = vmov 2  }
  0x21   :  { %vm53_vm9 = vmor %vm467_vm5, %vm471_vm6  ;;  %135 = vmatpush1.msra.mxu0 %v95_v13  ;;  %v87_v23 = vld [vmem:[#allocation5] sm:$0xff]  ;;  %s422_s5 = smov 1   ;;  %s423_s6 = smov 96   ;;  %362 = vset.pattern.permute.xlu0 %v424_v35  ;;  %v425_v36 = vmov 0   ;;  %vm187_vm1 = vcmask 7168   ;;  %vm205_vm2 = vcmask 15360  }
  0x22   :  { %vm56_vm10 = vmand %vm54_vm7, %vm55_vm8  ;;  %136 = vmatprep.subr.mxu0 %v94_v14  ;;  %361 = vset.pattern.permute.xlu1 %v425_v36  ;;  %vm207_vm3 = vcmask 23552   ;;  %v211_v41 = vsub.s32 0, %v460_v2  ;;  %v426_v57 = vmov 3   ;;  %v427_v58 = vmov 1   ;;  %s428_s7 = smov 64  }
  0x23   :  { %vm57_vm12 = vmor %vm53_vm9, %vm56_vm10  ;;  %137 = vmatpush1.msra.mxu0 %v93_v15  ;;  %vm258_vm5 = vcmask 253952   ;;  %vm280_vm6 = vcmask 254977   ;;  %vm306_vm7 = vcmask 256002   ;;  %vm333_vm8 = vcmask 257027  }
  0x24   :  { %v58_v20 = vsel %vm57_vm12, 1.0, %v418_v1  ;;  %138 = vmatprep.subr.mxu0 %v92_v16 }
  0x25   :  { %60 = vst.msk [vmem:[#allocation2] sm:$0xf] %vm59_vm11, %v58_v20  ;;  %139 = vmatpush1.msra.mxu0 %v91_v17 }
  0x26   :  { %63 = vst.msk [vmem:[#allocation2] sm:$0x3] %vm62_vm13, %v61_v18  ;;  %140 = vmatprep.subr.mxu0 %v90_v19 }
  0x27   :  { %141 = vmatpush1.msra.mxu0 %v89_v21 }
  0x28   :  { %142 = vmatprep.subr.mxu0 %v88_v22 }
  0x29   :  { %143 = vmatpush1.msra.mxu0 %v87_v23 }
  0x8d   :  { %v71_v24 = vpop.permute.xlu0 %70 }
  0x8e   :  { %74 = vst.msk [vmem:[#allocation2 + $0x2] sm:$0x1] %vm73_vm14, %v71_v24 }
  0x91   :  { %v82_v25 = vpop.permute.xlu0 %81 }
  0x92   :  { %85 = vst.msk [vmem:[#allocation2 + $0x3] sm:$0x1] %vm84_vm15, %v82_v25 }
  0x99   :  { %v86_v26 = vld [vmem:[#allocation2] sm:$0xf] }
  0x9a   :  { %345 = vmatmul.mubr.msk.f32.vlgmr.msra.gmra.mxu0 %vm101_vm0, %v86_v26 }
 0x15a   :  { %v484_v27 = vpop.f32.mrf.mxu0 }
 0x15b   :  { %v227_v30 = vrot.slane %v484_v27, 1  ;;  %v252_v3 = vrot.slane %v484_v27, 2  ;;  %v327_v18 = vrot.slane %v484_v27, 7 }
 0x15c   :  { %v180_v28 = vpop.f32.mrf.mxu0 }
 0x15d   :  { %189 = vrot.lane.b32.xlu1 %v180_v28, %s420_s0  ;;  %v196_v29 = vrot.slane %v180_v28, 2  ;;  %v192_v31 = vrot.slane %v180_v28, 1  ;;  %v229_v32 = vsub.f32 %v484_v27, %v227_v30  ;;  %v200_v33 = vrot.slane %v180_v28, 3 }
 0x15f   :  { %197 = vrot.lane.b32.xlu0 %v196_v29, %s421_s30  ;;  %v236_v34 = vrot.slane %v229_v32, 7 }
 0x161   :  { %193 = vrot.lane.b32.xlu1 %v192_v31, %s421_s30 }
 0x163   :  { %184 = vrot.lane.b32.xlu0 %v180_v28, %s422_s5 }
 0x165   :  { %201 = vrot.lane.b32.xlu1 %v200_v33, %s421_s30 }
 0x167   :  { %237 = vrot.lane.b32.xlu0 %v236_v34, %s423_s6 }
 0x1cf   :  { %v190_v37 = vpop.permute.xlu1 %189 }
 0x1d1   :  { %v198_v38 = vpop.permute.xlu0 %197 }
 0x1d3   :  { %v194_v39 = vpop.permute.xlu1 %193 }
 0x1d4   :  { %v204_v40 = vsel %vm187_vm1, %v190_v37, %v194_v39 }
 0x1d5   :  { %v185_v42 = vpop.permute.xlu0 %184  ;;  %v206_v43 = vsel %vm205_vm2, %v204_v40, %v198_v38 }
 0x1d6   :  { %v188_v47 = vsel %vm187_vm1, %v180_v28, %v185_v42 }
 0x1d7   :  { %v202_v44 = vpop.permute.xlu1 %201 }
 0x1d8   :  { %v208_v45 = vsel %vm207_vm3, %v206_v43, %v202_v44 }
 0x1d9   :  { %v212_v46 = vrot.slane %v208_v45, %v211_v41  ;;  %v238_v59 = vpop.permute.xlu0 %237 }
 0x1db   :  { %v213_v48 = vadd.f32 %v212_v46, %v188_v47 }
 0x1dd   :  { %vm214_vm4 = vcmp.gt.f32.partialorder %v213_v48, 0.0  ;;  %v215_v49 = vmul.f32 0.2, %v213_v48 }
 0x1df   :  { %v216_v50 = vsel %vm214_vm4, %v213_v48, %v215_v49 }
 0x1e0   :  { %v218_v51 = vrot.slane %v216_v50, 7 }
 0x1e2   :  { %v220_v52 = vsub.f32 %v216_v50, %v218_v51 }
 0x1e4   :  { %v221_v53 = vmul.f32 1.442695, %v220_v52 }
 0x1e6   :  { %366 = vpow2.f32 %v221_v53 }
 0x1f3   :  { %v367_v54 = vpop.eup %366 }
 0x1f4   :  { %v223_v55 = vadd.f32 1.0, %v367_v54 }
 0x1f6   :  { %368 = vrcp.f32 %v223_v55 }
 0x203   :  { %v369_v56 = vpop.eup %368 }
 0x204   :  { %283 = vperm.xlu0 %362, %v369_v56   ;;  %232 = vperm.xlu1 %361, %v369_v56  }
 0x208   :  { %312 = vrot.lane.b32.xlu0 %v236_v34, %s419_s1  ;;  %363 = vset.pattern.permute.xlu1 %v426_v57 }
 0x209   :  { %309 = vperm.xlu1 %363, %v369_v56   ;;  %365 = vset.pattern.permute.xlu0 %v426_v57 }
 0x20d   :  { %364 = vset.pattern.permute.xlu1 %v427_v58 }
 0x20e   :  { %261 = vperm.xlu1 %364, %v369_v56  }
 0x212   :  { %286 = vrot.lane.b32.xlu1 %v236_v34, %s428_s7 }
 0x27f   :  { %v284_v60 = vpop.permute.xlu0 %283  ;;  %v233_v61 = vpop.permute.xlu1 %232 }
 0x280   :  { %v240_v62 = vmul.f32 %v238_v59, %v233_v61 }
 0x282   :  { %242 = vrot.lane.b32.xlu1 %v240_v62, %s419_s1 }
 0x283   :  { %v313_v63 = vpop.permute.xlu0 %312 }
 0x284   :  { %v310_v0 = vpop.permute.xlu1 %309 }
 0x285   :  { %v315_v1 = vmul.f32 %v313_v63, %v310_v0 }
 0x287   :  { %317 = vrot.lane.b32.xlu1 %v315_v1, %s423_s6 }
 0x289   :  { %v262_v2 = vpop.permute.xlu1 %261 }
 0x28a   :  { %v264_v6 = vmul.f32 %v262_v2, %v238_v59 }
 0x28b   :  { %253 = vrot.lane.b32.xlu1 %v252_v3, %s423_s6 }
 0x28d   :  { %v287_v4 = vpop.permute.xlu1 %286 }
 0x28e   :  { %v289_v5 = vmul.f32 %v287_v4, %v284_v60 }
 0x290   :  { %291 = vrot.lane.b32.xlu0 %v289_v5, %s428_s7 }
 0x294   :  { %266 = vrot.lane.b32.xlu0 %v264_v6, %s419_s1 }
 0x298   :  { %275 = vrot.lane.b32.xlu0 %v227_v30, %s423_s6 }
 0x2f4   :  { %v243_v7 = vpop.permute.xlu1 %242 }
 0x2f5   :  { %v245_v8 = vadd.f32 %v243_v7, %v484_v27 }
 0x2f7   :  { %v247_v9 = vrot.slane %v245_v8, 1 }
 0x2f9   :  { %248 = vrot.lane.b32.xlu1 %v247_v9, %s423_s6  ;;  %v318_v12 = vpop.permute.xlu1 %317 }
 0x2fa   :  { %v320_v15 = vadd.f32 %v318_v12, %v484_v27 }
 0x2fc   :  { %v322_v17 = vrot.slane %v320_v15, 6 }
 0x2fd   :  { %v254_v19 = vpop.permute.xlu1 %253 }
 0x302   :  { %v292_v10 = vpop.permute.xlu0 %291 }
 0x303   :  { %v294_v11 = vadd.f32 %v292_v10, %v484_v27 }
 0x305   :  { %v296_v13 = vrot.slane %v294_v11, 7 }
 0x306   :  { %v267_v14 = vpop.permute.xlu0 %266 }
 0x307   :  { %v269_v16 = vadd.f32 %v267_v14, %v484_v27  ;;  %297 = vrot.lane.b32.xlu1 %v296_v13, %s428_s7 }
 0x309   :  { %271 = vrot.lane.b32.xlu0 %v269_v16, %s423_s6 }
 0x30a   :  { %v276_v24 = vpop.permute.xlu0 %275 }
 0x30b   :  { %301 = vrot.lane.b32.xlu1 %v484_v27, %s428_s7 }
 0x30d   :  { %323 = vrot.lane.b32.xlu0 %v322_v17, %s419_s1 }
 0x311   :  { %328 = vrot.lane.b32.xlu0 %v327_v18, %s419_s1 }
 0x36b   :  { %v249_v20 = vpop.permute.xlu1 %248 }
 0x36c   :  { %v251_v21 = vadd.f32 %v249_v20, %v484_v27 }
 0x36e   :  { %v256_v22 = vadd.f32 %v254_v19, %v251_v21 }
 0x370   :  { %v257_v23 = vmax.f32 %v256_v22, 0.0 }
 0x372   :  { %259 = vst.msk [vmem:[%s535_s4] sm:$0x1] %vm258_vm5, %v257_v23 }
 0x379   :  { %v298_v25 = vpop.permute.xlu1 %297 }
 0x37a   :  { %v300_v28 = vadd.f32 %v298_v25, %v484_v27 }
 0x37b   :  { %v272_v26 = vpop.permute.xlu0 %271 }
 0x37c   :  { %v274_v29 = vadd.f32 %v272_v26, %v484_v27 }
 0x37d   :  { %v302_v30 = vpop.permute.xlu1 %301 }
 0x37e   :  { %v278_v31 = vadd.f32 %v276_v24, %v274_v29  ;;  %v304_v32 = vadd.f32 %v302_v30, %v300_v28 }
 0x37f   :  { %v324_v33 = vpop.permute.xlu0 %323 }
 0x380   :  { %v279_v34 = vmax.f32 %v278_v31, 0.0  ;;  %v305_v35 = vmax.f32 %v304_v32, 0.0  ;;  %v326_v36 = vadd.f32 %v324_v33, %v484_v27 }
 0x382   :  { %281 = vst.msk [vmem:[%s535_s4] sm:$0x2] %vm280_vm6, %v279_v34 }
 0x383   :  { %307 = vst.msk [vmem:[%s535_s4] sm:$0x4] %vm306_vm7, %v305_v35  ;;  %v329_v37 = vpop.permute.xlu0 %328 }
 0x384   :  { %v331_v38 = vadd.f32 %v329_v37, %v326_v36 }
 0x386   :  { %v332_v39 = vmax.f32 %v331_v38, 0.0 }
 0x388   :  { %334 = vst.msk [vmem:[%s535_s4] sm:$0x8] %vm333_vm8, %v332_v39 }
 0x389   :  { %339 = vsyncpa [#allocation4], 1 }
 0x38a   :  { %340 = vsyncpa [#allocation6], 1 }

</bundles_post_ra>
